<compile_context>
chip_gen: v6e
topology: v6e:2x2x1
jax: 0.10.0
libtpu: 0.0.40
codegen_flags: <defaults>
</compile_context>

<pallas_src>
import jax
import jax.numpy as jnp
from jax.experimental import pallas as pl
from jax.experimental.pallas import tpu as pltpu

OBS_DIM = 8       # env.observation_space.shape[0] for LunarLander-v2
HIDDEN = 128
N_ACTIONS = 4     # env.action_space.n for LunarLander-v2
LANE = 128        # lane-dense width for the padded layer-3 / softmax


def policy_kernel(x_ref, w1_ref, b1_ref, w2_ref, b2_ref, w3_ref, b3_ref, out_ref):
    # Layer 1: Linear(8, 128) + ReLU   (MXU matmul, f32 accumulate)
    h1 = jnp.dot(x_ref[...], w1_ref[...], preferred_element_type=jnp.float32)
    h1 = jnp.maximum(h1 + b1_ref[...], 0.0)

    # Layer 2: Linear(128, 128) + ReLU
    h2 = jnp.dot(h1, w2_ref[...], preferred_element_type=jnp.float32)
    h2 = jnp.maximum(h2 + b2_ref[...], 0.0)

    # Layer 3: Linear(128, 4) padded to 128 output lanes (lane-dense compute).
    # Padded bias lanes are -1e30 -> exp() = 0, so the softmax is unchanged.
    logits = jnp.dot(h2, w3_ref[...], preferred_element_type=jnp.float32)
    logits = logits + b3_ref[...]

    # Numerically stable softmax over the (padded) action dimension.
    m = jnp.max(logits, axis=-1, keepdims=True)
    e = jnp.exp(logits - m)
    denom = jnp.sum(e, axis=-1, keepdims=True)
    probs = e * pl.reciprocal(denom, approx=False)   # EUP path, exact

    # Only the real 4 action columns are written back.
    out_ref[...] = probs[:, :N_ACTIONS].astype(out_ref.dtype)


def policy_forward(x, params, *, block_b=512):
    w1, b1, w2, b2, w3, b3 = params
    x = x.astype(jnp.float32)
    B = x.shape[0]

    # Lane-dense padding of layer 3 (trace-time, essentially free).
    w3p = jnp.zeros((HIDDEN, LANE), jnp.float32).at[:, :N_ACTIONS].set(w3)
    b3p = jnp.full((1, LANE), -1e30, jnp.float32).at[:, :N_ACTIONS].set(b3)

    # Batch tile: multiple of 8 sublanes, capped at block_b; pad B up to a
    # whole number of tiles so the grid is exact and the kernel branch-free.
    tb = min(block_b, max(8, ((B + 7) // 8) * 8))
    tb = ((tb + 7) // 8) * 8
    b_pad = ((B + tb - 1) // tb) * tb
    if b_pad != B:
        x = jnp.pad(x, ((0, b_pad - B), (0, 0)))

    grid = (b_pad // tb,)
    const2d = lambda i: (0, 0)   # weights/biases stay resident in VMEM

    out = pl.pallas_call(
        policy_kernel,
        out_shape=jax.ShapeDtypeStruct((b_pad, N_ACTIONS), jnp.float32),
        grid=grid,
        in_specs=[
            pl.BlockSpec((tb, OBS_DIM), lambda i: (i, 0)),     # x tile
            pl.BlockSpec((OBS_DIM, HIDDEN), const2d),          # w1
            pl.BlockSpec((1, HIDDEN), const2d),                # b1
            pl.BlockSpec((HIDDEN, HIDDEN), const2d),           # w2
            pl.BlockSpec((1, HIDDEN), const2d),                # b2
            pl.BlockSpec((HIDDEN, LANE), const2d),             # w3 (padded)
            pl.BlockSpec((1, LANE), const2d),                  # b3 (padded)
        ],
        out_specs=pl.BlockSpec((tb, N_ACTIONS), lambda i: (i, 0)),
        compiler_params=pltpu.CompilerParams(
            dimension_semantics=("parallel",)),                # megacore on v7x
    )(x, w1, b1, w2, b2, w3p, b3p)

    return out[:B]


def init_params(key):
    k1, k2, k3, k4, k5, k6 = jax.random.split(key, 6)

    # Deterministic synthetic init (uniform ~ torch Linear default scale).
    def lin(kw, kb, fan_in, fan_out):
        bound = 1.0 / jnp.sqrt(fan_in)
        w = jax.random.uniform(kw, (fan_in, fan_out), jnp.float32, -bound, bound)
        b = jax.random.uniform(kb, (1, fan_out), jnp.float32, -bound, bound)
        return w, b

    w1, b1 = lin(k1, k2, OBS_DIM, HIDDEN)
    w2, b2 = lin(k3, k4, HIDDEN, HIDDEN)
    w3, b3 = lin(k5, k6, HIDDEN, N_ACTIONS)
    return (w1, b1, w2, b2, w3, b3)


def policy_ref(x, params):
    w1, b1, w2, b2, w3, b3 = params
    h1 = jnp.maximum(x @ w1 + b1, 0.0)
    h2 = jnp.maximum(h1 @ w2 + b2, 0.0)
    logits = h2 @ w3 + b3
    return jax.nn.softmax(logits, axis=-1)


if __name__ == "__main__":
    key = jax.random.PRNGKey(0)
    kx, kp, kx2 = jax.random.split(key, 3)
    params = init_params(kp)

    # Small demo batch.
    B = 8
    x = jax.random.normal(kx, (B, OBS_DIM), dtype=jnp.float32)
    out = jax.block_until_ready(policy_forward(x, params))
    ref = jax.block_until_ready(policy_ref(x, params))
    assert out.shape == (B, N_ACTIONS)
    assert jnp.allclose(jnp.sum(out, axis=-1), 1.0, atol=1e-5)
    assert jnp.allclose(out, ref, atol=1e-5, rtol=1e-5)

    # Ragged batch exercises the tail-padding path of the gridded kernel.
    B2 = 20
    x2 = jax.random.normal(kx2, (B2, OBS_DIM), dtype=jnp.float32)
    out2 = jax.block_until_ready(policy_forward(x2, params))
    ref2 = jax.block_until_ready(policy_ref(x2, params))
    assert out2.shape == (B2, N_ACTIONS)
    assert jnp.allclose(jnp.sum(out2, axis=-1), 1.0, atol=1e-5)
    assert jnp.allclose(out2, ref2, atol=1e-5, rtol=1e-5)

    print("KERNEL_OK")
</pallas_src>

<mosaic_0001>
module attributes {stable_mosaic.version = 11 : i64} {
  func.func @policy_kernel(%arg0: i32, %arg1: memref<8x8xf32, #tpu.memory_space<vmem>>, %arg2: memref<8x128xf32, #tpu.memory_space<vmem>>, %arg3: memref<1x128xf32, #tpu.memory_space<vmem>>, %arg4: memref<128x128xf32, #tpu.memory_space<vmem>>, %arg5: memref<1x128xf32, #tpu.memory_space<vmem>>, %arg6: memref<128x128xf32, #tpu.memory_space<vmem>>, %arg7: memref<1x128xf32, #tpu.memory_space<vmem>>, %arg8: memref<8x4xf32, #tpu.memory_space<vmem>>) attributes {dimension_semantics = [#tpu.dimension_semantics<parallel>], iteration_bounds = array<i64: 1>, scalar_prefetch = 0 : i64, scratch_operands = 0 : i64, tpu.core_type = #tpu.core_type<tc>, window_params = [{transform_indices = @transform_0, window_bounds = array<i64: 8, 8>}, {pipeline_mode = #tpu.pipeline_mode<synchronous>, transform_indices = @transform_1, window_bounds = array<i64: 8, 128>}, {pipeline_mode = #tpu.pipeline_mode<synchronous>, transform_indices = @transform_2, window_bounds = array<i64: 1, 128>}, {pipeline_mode = #tpu.pipeline_mode<synchronous>, transform_indices = @transform_3, window_bounds = array<i64: 128, 128>}, {pipeline_mode = #tpu.pipeline_mode<synchronous>, transform_indices = @transform_4, window_bounds = array<i64: 1, 128>}, {pipeline_mode = #tpu.pipeline_mode<synchronous>, transform_indices = @transform_5, window_bounds = array<i64: 128, 128>}, {pipeline_mode = #tpu.pipeline_mode<synchronous>, transform_indices = @transform_6, window_bounds = array<i64: 1, 128>}, {transform_indices = @transform_7, window_bounds = array<i64: 8, 4>}]} {
    %c0 = arith.constant 0 : index
    %c0_0 = arith.constant 0 : index
    %0 = vector.load %arg1[%c0, %c0_0] : memref<8x8xf32, #tpu.memory_space<vmem>>, vector<8x8xf32>
    %c0_1 = arith.constant 0 : index
    %c0_2 = arith.constant 0 : index
    %1 = vector.load %arg2[%c0_1, %c0_2] : memref<8x128xf32, #tpu.memory_space<vmem>>, vector<8x128xf32>
    %cst = arith.constant dense<0.000000e+00> : vector<8x128xf32>
    %2 = tpu.matmul %0, %1, %cst {dimension_numbers = #tpu.dot_dimension_numbers<[1], [0], [0], [1], [0, 0, 1, 1], [], []>} : vector<8x8xf32>, vector<8x128xf32>, vector<8x128xf32> -> vector<8x128xf32>
    %c0_3 = arith.constant 0 : index
    %c0_4 = arith.constant 0 : index
    %3 = vector.load %arg3[%c0_3, %c0_4] : memref<1x128xf32, #tpu.memory_space<vmem>>, vector<1x128xf32>
    %4 = vector.broadcast %3 : vector<1x128xf32> to vector<8x128xf32>
    %5 = arith.addf %2, %4 : vector<8x128xf32>
    %cst_5 = arith.constant 0.000000e+00 : f32
    %6 = vector.broadcast %cst_5 : f32 to vector<8x128xf32>
    %7 = arith.maximumf %5, %6 : vector<8x128xf32>
    %c0_6 = arith.constant 0 : index
    %c0_7 = arith.constant 0 : index
    %8 = vector.load %arg4[%c0_6, %c0_7] : memref<128x128xf32, #tpu.memory_space<vmem>>, vector<128x128xf32>
    %cst_8 = arith.constant dense<0.000000e+00> : vector<8x128xf32>
    %9 = tpu.matmul %7, %8, %cst_8 {dimension_numbers = #tpu.dot_dimension_numbers<[1], [0], [0], [1], [0, 0, 1, 1], [], []>} : vector<8x128xf32>, vector<128x128xf32>, vector<8x128xf32> -> vector<8x128xf32>
    %c0_9 = arith.constant 0 : index
    %c0_10 = arith.constant 0 : index
    %10 = vector.load %arg5[%c0_9, %c0_10] : memref<1x128xf32, #tpu.memory_space<vmem>>, vector<1x128xf32>
    %11 = vector.broadcast %10 : vector<1x128xf32> to vector<8x128xf32>
    %12 = arith.addf %9, %11 : vector<8x128xf32>
    %cst_11 = arith.constant 0.000000e+00 : f32
    %13 = vector.broadcast %cst_11 : f32 to vector<8x128xf32>
    %14 = arith.maximumf %12, %13 : vector<8x128xf32>
    %c0_12 = arith.constant 0 : index
    %c0_13 = arith.constant 0 : index
    %15 = vector.load %arg6[%c0_12, %c0_13] : memref<128x128xf32, #tpu.memory_space<vmem>>, vector<128x128xf32>
    %cst_14 = arith.constant dense<0.000000e+00> : vector<8x128xf32>
    %16 = tpu.matmul %14, %15, %cst_14 {dimension_numbers = #tpu.dot_dimension_numbers<[1], [0], [0], [1], [0, 0, 1, 1], [], []>} : vector<8x128xf32>, vector<128x128xf32>, vector<8x128xf32> -> vector<8x128xf32>
    %c0_15 = arith.constant 0 : index
    %c0_16 = arith.constant 0 : index
    %17 = vector.load %arg7[%c0_15, %c0_16] : memref<1x128xf32, #tpu.memory_space<vmem>>, vector<1x128xf32>
    %18 = vector.broadcast %17 : vector<1x128xf32> to vector<8x128xf32>
    %19 = arith.addf %16, %18 : vector<8x128xf32>
    %cst_17 = arith.constant dense<0xFF800000> : vector<8xf32>
    %20 = vector.multi_reduction <maximumf>, %19, %cst_17 [1] : vector<8x128xf32> to vector<8xf32>
    %21 = vector.shape_cast %20 : vector<8xf32> to vector<8x1xf32>
    %22 = vector.broadcast %21 : vector<8x1xf32> to vector<8x128xf32>
    %23 = arith.subf %19, %22 : vector<8x128xf32>
    %24 = math.exp %23 : vector<8x128xf32>
    %cst_18 = arith.constant dense<0.000000e+00> : vector<8xf32>
    %25 = vector.multi_reduction <add>, %24, %cst_18 [1] : vector<8x128xf32> to vector<8xf32>
    %26 = vector.shape_cast %25 : vector<8xf32> to vector<8x1xf32>
    %27 = tpu.reciprocal %26 : vector<8x1xf32> -> vector<8x1xf32>
    %28 = vector.broadcast %27 : vector<8x1xf32> to vector<8x128xf32>
    %29 = arith.mulf %24, %28 : vector<8x128xf32>
    %30 = vector.extract_strided_slice %29 {offsets = [0, 0], sizes = [8, 4], strides = [1, 1]} : vector<8x128xf32> to vector<8x4xf32>
    %c0_19 = arith.constant 0 : index
    %c0_20 = arith.constant 0 : index
    %31 = vector.load %arg8[%c0_19, %c0_20] : memref<8x4xf32, #tpu.memory_space<vmem>>, vector<8x4xf32>
    tpu.vector_store %arg8[%c0_19, %c0_20], %30 {strides = array<i32>} : memref<8x4xf32, #tpu.memory_space<vmem>>, vector<8x4xf32>,
    return
  }
  func.func @transform_0(%arg0: i32) -> (i32, i32) {
    %c0_i32 = arith.constant 0 : i32
    %c0_i32_0 = arith.constant 0 : i32
    return %arg0, %c0_i32 : i32, i32
  }
  func.func @transform_1(%arg0: i32) -> (i32, i32) {
    %c0_i32 = arith.constant 0 : i32
    %c0_i32_0 = arith.constant 0 : i32
    %c0_i32_1 = arith.constant 0 : i32
    return %c0_i32, %c0_i32_0 : i32, i32
  }
  func.func @transform_2(%arg0: i32) -> (i32, i32) {
    %c0_i32 = arith.constant 0 : i32
    %c0_i32_0 = arith.constant 0 : i32
    %c0_i32_1 = arith.constant 0 : i32
    return %c0_i32, %c0_i32_0 : i32, i32
  }
  func.func @transform_3(%arg0: i32) -> (i32, i32) {
    %c0_i32 = arith.constant 0 : i32
    %c0_i32_0 = arith.constant 0 : i32
    %c0_i32_1 = arith.constant 0 : i32
    return %c0_i32, %c0_i32_0 : i32, i32
  }
  func.func @transform_4(%arg0: i32) -> (i32, i32) {
    %c0_i32 = arith.constant 0 : i32
    %c0_i32_0 = arith.constant 0 : i32
    %c0_i32_1 = arith.constant 0 : i32
    return %c0_i32, %c0_i32_0 : i32, i32
  }
  func.func @transform_5(%arg0: i32) -> (i32, i32) {
    %c0_i32 = arith.constant 0 : i32
    %c0_i32_0 = arith.constant 0 : i32
    %c0_i32_1 = arith.constant 0 : i32
    return %c0_i32, %c0_i32_0 : i32, i32
  }
  func.func @transform_6(%arg0: i32) -> (i32, i32) {
    %c0_i32 = arith.constant 0 : i32
    %c0_i32_0 = arith.constant 0 : i32
    %c0_i32_1 = arith.constant 0 : i32
    return %c0_i32, %c0_i32_0 : i32, i32
  }
  func.func @transform_7(%arg0: i32) -> (i32, i32) {
    %c0_i32 = arith.constant 0 : i32
    %c0_i32_0 = arith.constant 0 : i32
    return %arg0, %c0_i32 : i32, i32
  }
}

</mosaic_0001>

<bundles_post_ra>
// kernel: tpu_custom_call.1
= control target key start
LH: loop header
LB: loop body
LE: loop exit
PB: predicated region body
PF: predicated region fallthrough
CT: control target
= control target key end

     0   :  { %12 = vsyncpa [#allocation3], 0  ;;  %s690_s0 = inlined_call_operand.hbm [shape: f32[8,8], index: 0, kind: input, shape index: {}]   ;;  %s691_s1 = inlined_call_operand.hbm [shape: f32[8,128], index: 1, kind: input, shape index: {}]   ;;  %s692_s2 = inlined_call_operand.vmem [shape: f32[1,128], index: 2, kind: input, shape index: {}]   ;;  %s693_s3 = inlined_call_operand.hbm [shape: f32[128,128], index: 3, kind: input, shape index: {}]   ;;  %s694_s4 = inlined_call_operand.vmem [shape: f32[1,128], index: 4, kind: input, shape index: {}]   ;;  %s695_s5 = inlined_call_operand.hbm [shape: f32[128,128], index: 5, kind: input, shape index: {}]   ;;  %s696_s6 = inlined_call_operand.vmem [shape: f32[1,128], index: 6, kind: input, shape index: {}]   ;;  %s697_s7 = inlined_call_operand.vmem [shape: f32[8,4], index: 7, kind: output, shape index: {}]  }
   0x1   :  { %13 = vsyncpa [#allocation5], 0 }
   0x2   :  { %14 = vsyncpa [#allocation8], 0  ;;  %s579_s24 = smov [#allocation4]   ;;  %s580_s26 = smov [#allocation2]  }
   0x3   :  { %s31_s25 = sshll.u32 %s579_s24, 4  ;;  %s21_s27 = sshll.u32 %s580_s26, 4  ;;  %s32_s25 = int_to_ptr.vmem [resolvable:$true] %s31_s25  ;;  %s22_s27 = int_to_ptr.vmem [resolvable:$true] %s21_s27 }
   0x4   :  { %s501_s28 = scalar_lea.vmem %s32_s25, 128  ;;  %p506_p1 = scmp.lt.s32.totalorder %s32_s25, %s32_s25 }
   0x5   :  { %p502_p0 = scmp.ne.s32.totalorder %s32_s25, %s501_s28  ;;  %p507_p2 = scmp.lt.s32.totalorder %s501_s28, %s501_s28 }
   0x7   :  { %p508_p3 = por %p507_p2, %p506_p1 }
   0x9   :  { %p509_p4 = pnand %p508_p3, %p502_p0 }
   0xb   :  { %512 = shalt.err (!%p509_p4)
}
   0xc   :  { %34 = dma.hbm_to_vmem [thread:$0]  %s691_s1, 128, %s32_s25, [#allocation5]  }
   0xd   :  { %s521_s8 = scalar_lea.vmem %s22_s27, 128  ;;  %p526_p6 = scmp.lt.s32.totalorder %s22_s27, %s22_s27 }
   0xe   :  { %p522_p5 = scmp.ne.s32.totalorder %s22_s27, %s521_s8  ;;  %p527_p7 = scmp.lt.s32.totalorder %s521_s8, %s521_s8 }
  0x10   :  { %p528_p8 = por %p527_p7, %p526_p6 }
  0x12   :  { %p529_p9 = pnand %p528_p8, %p522_p5 }
  0x14   :  { %532 = shalt.err (!%p529_p9)
}
  0x15   :  { %24 = dma.hbm_to_vmem [thread:$0]  %s690_s0, 128, %s22_s27, [#allocation3]  }
  0x16   :  { %s581_s11 = smov [#allocation6]  }
  0x17   :  { %s42_s12 = sshll.u32 %s581_s11, 4  ;;  %s43_s12 = int_to_ptr.vmem [resolvable:$true] %s42_s12 }
  0x18   :  { %s541_s13 = scalar_lea.vmem %s43_s12, 2048  ;;  %p546_p11 = scmp.lt.s32.totalorder %s43_s12, %s43_s12 }
  0x19   :  { %p542_p10 = scmp.ne.s32.totalorder %s43_s12, %s541_s13  ;;  %p547_p12 = scmp.lt.s32.totalorder %s541_s13, %s541_s13 }
  0x1b   :  { %p548_p13 = por %p547_p12, %p546_p11 }
  0x1d   :  { %p549_p0 = pnand %p548_p13, %p542_p10 }
  0x1f   :  { %552 = shalt.err (!%p549_p0)
}
  0x20   :  { %s582_s1 = smov 128   ;;  %s583_s14 = smov 8  }
  0x21   :  { %48 = dma.hbm_to_vmem [thread:$0]  %s693_s3, 2048, %s43_s12, [#allocation5], %s582_s1, %s582_s1, %s583_s14  }
  0x22   :  { %s584_s17 = smov [#allocation7]  }
  0x23   :  { %s56_s18 = sshll.u32 %s584_s17, 4  ;;  %s57_s18 = int_to_ptr.vmem [resolvable:$true] %s56_s18 }
  0x24   :  { %s561_s0 = scalar_lea.vmem %s57_s18, 2048  ;;  %p566_p2 = scmp.lt.s32.totalorder %s57_s18, %s57_s18 }
  0x25   :  { %p562_p1 = scmp.ne.s32.totalorder %s57_s18, %s561_s0  ;;  %p567_p3 = scmp.lt.s32.totalorder %s561_s0, %s561_s0 }
  0x27   :  { %p568_p4 = por %p567_p3, %p566_p2 }
  0x29   :  { %p569_p5 = pnand %p568_p4, %p562_p1 }
  0x2b   :  { %572 = shalt.err (!%p569_p5)
}
  0x2c   :  { %62 = dma.hbm_to_vmem [thread:$0]  %s695_s5, 2048, %s57_s18, [#allocation8], %s582_s1, %s582_s1, %s583_s14  }
  0x2d   :  { %573 = dma.done.wait [#allocation3], 128  }
  0x2e   :  { %574 = vsyncadd [#allocation3], 4294967168 }
  0x2f   :  { %575 = dma.done.wait [#allocation5], 2176  }
  0x30   :  { %576 = vsyncadd [#allocation5], 4294965120 }
  0x31   :  { %577 = dma.done.wait [#allocation8], 2048  }
  0x32   :  { %578 = vsyncadd [#allocation8], 4294965248  ;;  %v585_v0 = vmov 0.0   ;;  %vm586_vm0 = vmmov 0   ;;  %vm86_vm1 = vcmask 64512   ;;  %v78_v1 = vld [vmem:[#allocation4] sm:$0xff] }
  0x33   :  { %406 = vmatprep.subr.mxu0 %v585_v0  ;;  %408 = vmatprep.mubr.msk.f32.mxu0 %vm586_vm0, %v585_v0  ;;  %v77_v2 = vld [vmem:[#allocation2] sm:$0xff]  ;;  %v176_v3 = vld [vmem:[#allocation6 + $0x78] sm:$0xff]  ;;  %v174_v5 = vld [vmem:[#allocation6 + $0x68] sm:$0xff]  ;;  %vm357_vm2 = vcmask 31744  }
  0x34   :  { %411 = vmatprep.subr.mxu1 %v585_v0  ;;  %443 = vmatprep.mubr.msk.f32.mxu1 %vm586_vm0, %v585_v0  ;;  %v175_v4 = vld [vmem:[#allocation6 + $0x70] sm:$0xff]  ;;  %v173_v6 = vld [vmem:[#allocation6 + $0x60] sm:$0xff]  ;;  %v172_v7 = vld [vmem:[#allocation6 + $0x58] sm:$0xff] }
  0x35   :  { %407 = vmatpush3.msra.mxu0 %v78_v1  ;;  %412 = vmatpush3.msra.mxu1 %v176_v3  ;;  %v171_v8 = vld [vmem:[#allocation6 + $0x50] sm:$0xff]  ;;  %v170_v9 = vld [vmem:[#allocation6 + $0x48] sm:$0xff]  ;;  %v169_v10 = vld [vmem:[#allocation6 + $0x40] sm:$0xff] }
  0x36   :  { %409 = vmatmul.mubr.msk.f32.vlgmr.msra.gmra.mxu0 %vm86_vm1, %v77_v2  ;;  %413 = vmatprep.subr.mxu1 %v585_v0  ;;  %v168_v11 = vld [vmem:[#allocation6 + $0x38] sm:$0xff]  ;;  %v167_v12 = vld [vmem:[#allocation6 + $0x30] sm:$0xff]  ;;  %v166_v13 = vld [vmem:[#allocation6 + $0x28] sm:$0xff] }
  0x37   :  { %414 = vmatpush3.msra.mxu1 %v175_v4  ;;  %446 = vmatprep.subr.mxu0 %v585_v0  ;;  %v165_v14 = vld [vmem:[#allocation6 + $0x20] sm:$0xff]  ;;  %v164_v15 = vld [vmem:[#allocation6 + $0x18] sm:$0xff]  ;;  %v163_v16 = vld [vmem:[#allocation6 + $0x10] sm:$0xff] }
  0x38   :  { %415 = vmatprep.subr.mxu1 %v585_v0  ;;  %478 = vmatprep.mubr.msk.f32.mxu0 %vm586_vm0, %v585_v0  ;;  %v162_v17 = vld [vmem:[#allocation6 + $0x8] sm:$0xff]  ;;  %v161_v18 = vld [vmem:[#allocation6] sm:$0xff]  ;;  %v270_v19 = vld [vmem:[#allocation7 + $0x78] sm:$0xff] }
  0x39   :  { %416 = vmatpush3.msra.mxu1 %v174_v5  ;;  %v269_v20 = vld [vmem:[#allocation7 + $0x70] sm:$0xff]  ;;  %447 = vmatpush3.msra.mxu0 %v270_v19  ;;  %v268_v21 = vld [vmem:[#allocation7 + $0x68] sm:$0xff]  ;;  %v267_v22 = vld [vmem:[#allocation7 + $0x60] sm:$0xff] }
  0x3a   :  { %417 = vmatprep.subr.mxu1 %v585_v0  ;;  %448 = vmatprep.subr.mxu0 %v585_v0  ;;  %v266_v23 = vld [vmem:[#allocation7 + $0x58] sm:$0xff]  ;;  %v265_v24 = vld [vmem:[#allocation7 + $0x50] sm:$0xff]  ;;  %v264_v25 = vld [vmem:[#allocation7 + $0x48] sm:$0xff] }
  0x3b   :  { %418 = vmatpush3.msra.mxu1 %v173_v6  ;;  %449 = vmatpush3.msra.mxu0 %v269_v20  ;;  %v263_v26 = vld [vmem:[#allocation7 + $0x40] sm:$0xff]  ;;  %v262_v27 = vld [vmem:[#allocation7 + $0x38] sm:$0xff]  ;;  %v261_v28 = vld [vmem:[#allocation7 + $0x30] sm:$0xff] }
  0x3c   :  { %419 = vmatprep.subr.mxu1 %v585_v0  ;;  %450 = vmatprep.subr.mxu0 %v585_v0  ;;  %v260_v29 = vld [vmem:[#allocation7 + $0x28] sm:$0xff]  ;;  %v259_v30 = vld [vmem:[#allocation7 + $0x20] sm:$0xff]  ;;  %v258_v31 = vld [vmem:[#allocation7 + $0x18] sm:$0xff] }
  0x3d   :  { %420 = vmatpush3.msra.mxu1 %v172_v7  ;;  %451 = vmatpush3.msra.mxu0 %v268_v21  ;;  %v366_v32 = vld [vmem:[%s692_s2] ss:$0 sm:$0xff]  ;;  %v256_v38 = vld [vmem:[#allocation7 + $0x8] sm:$0xff]  ;;  %v255_v39 = vld [vmem:[#allocation7] sm:$0xff] }
  0x3e   :  { %421 = vmatprep.subr.mxu1 %v585_v0  ;;  %452 = vmatprep.subr.mxu0 %v585_v0  ;;  %v257_v37 = vld [vmem:[#allocation7 + $0x10] sm:$0xff] }
  0x3f   :  { %422 = vmatpush3.msra.mxu1 %v171_v8  ;;  %453 = vmatpush3.msra.mxu0 %v267_v22  ;;  %v368_v40 = vld [vmem:[%s694_s4] ss:$0 sm:$0xff] }
  0x40   :  { %423 = vmatprep.subr.mxu1 %v585_v0  ;;  %454 = vmatprep.subr.mxu0 %v585_v0  ;;  %v369_v45 = vld [vmem:[%s696_s6] ss:$0 sm:$0xff] }
  0x41   :  { %424 = vmatpush3.msra.mxu1 %v170_v9  ;;  %455 = vmatpush3.msra.mxu0 %v266_v23 }
  0x42   :  { %425 = vmatprep.subr.mxu1 %v585_v0  ;;  %456 = vmatprep.subr.mxu0 %v585_v0 }
  0x43   :  { %426 = vmatpush3.msra.mxu1 %v169_v10  ;;  %457 = vmatpush3.msra.mxu0 %v265_v24 }
  0x44   :  { %427 = vmatprep.subr.mxu1 %v585_v0  ;;  %458 = vmatprep.subr.mxu0 %v585_v0 }
  0x45   :  { %428 = vmatpush3.msra.mxu1 %v168_v11  ;;  %459 = vmatpush3.msra.mxu0 %v264_v25 }
  0x46   :  { %429 = vmatprep.subr.mxu1 %v585_v0  ;;  %460 = vmatprep.subr.mxu0 %v585_v0 }
  0x47   :  { %430 = vmatpush3.msra.mxu1 %v167_v12  ;;  %461 = vmatpush3.msra.mxu0 %v263_v26 }
  0x48   :  { %431 = vmatprep.subr.mxu1 %v585_v0  ;;  %462 = vmatprep.subr.mxu0 %v585_v0 }
  0x49   :  { %432 = vmatpush3.msra.mxu1 %v166_v13  ;;  %463 = vmatpush3.msra.mxu0 %v262_v27 }
  0x4a   :  { %433 = vmatprep.subr.mxu1 %v585_v0  ;;  %464 = vmatprep.subr.mxu0 %v585_v0 }
  0x4b   :  { %434 = vmatpush3.msra.mxu1 %v165_v14  ;;  %465 = vmatpush3.msra.mxu0 %v261_v28 }
  0x4c   :  { %435 = vmatprep.subr.mxu1 %v585_v0  ;;  %466 = vmatprep.subr.mxu0 %v585_v0 }
  0x4d   :  { %436 = vmatpush3.msra.mxu1 %v164_v15  ;;  %467 = vmatpush3.msra.mxu0 %v260_v29 }
  0x4e   :  { %437 = vmatprep.subr.mxu1 %v585_v0  ;;  %468 = vmatprep.subr.mxu0 %v585_v0 }
  0x4f   :  { %438 = vmatpush3.msra.mxu1 %v163_v16  ;;  %469 = vmatpush3.msra.mxu0 %v259_v30 }
  0x50   :  { %439 = vmatprep.subr.mxu1 %v585_v0  ;;  %470 = vmatprep.subr.mxu0 %v585_v0 }
  0x51   :  { %440 = vmatpush3.msra.mxu1 %v162_v17  ;;  %471 = vmatpush3.msra.mxu0 %v258_v31 }
  0x52   :  { %441 = vmatprep.subr.mxu1 %v585_v0  ;;  %472 = vmatprep.subr.mxu0 %v585_v0 }
  0x53   :  { %442 = vmatpush3.msra.mxu1 %v161_v18  ;;  %473 = vmatpush3.msra.mxu0 %v257_v37 }
  0x54   :  { %474 = vmatprep.subr.mxu0 %v585_v0 }
  0x55   :  { %475 = vmatpush3.msra.mxu0 %v256_v38 }
  0x56   :  { %476 = vmatprep.subr.mxu0 %v585_v0 }
  0x57   :  { %477 = vmatpush3.msra.mxu0 %v255_v39 }
  0xf6   :  { %v156_v33 = vpop.f32.mrf.mxu0 }
  0xf7   :  { %v157_v34 = vadd.f32 %v366_v32, %v156_v33 }
  0xf8   :  { %v410_v35 = vpop.f32.mrf.mxu0 }
  0xf9   :  { %v160_v36 = vmax.f32 %v157_v34, 0.0 }
  0xfb   :  { %444 = vmatmul.mubr.f32.vlgmr.msra.gmra.mxu1 %v160_v36 }
 0x1bb   :  { %v250_v41 = vpop.f32.mrf.mxu1 }
 0x1bc   :  { %v251_v42 = vadd.f32 %v368_v40, %v250_v41 }
 0x1bd   :  { %v445_v43 = vpop.f32.mrf.mxu1 }
 0x1be   :  { %v254_v44 = vmax.f32 %v251_v42, 0.0 }
 0x1c0   :  { %479 = vmatmul.mubr.f32.vlgmr.msra.gmra.mxu0 %v254_v44 }
 0x280   :  { %v344_v46 = vpop.f32.mrf.mxu0 }
 0x281   :  { %v345_v47 = vadd.f32 %v369_v45, %v344_v46 }
 0x282   :  { %v480_v48 = vpop.f32.mrf.mxu0 }
 0x283   :  { %348 = vmax.xlane.f32.xlu0 %v345_v47 }
 0x30c   :  { %v349_v49 = vpop.xlane.xlu0 %348 }
 0x30d   :  { %v350_v50 = vsub.f32 %v345_v47, %v349_v49 }
 0x30f   :  { %v351_v51 = vmul.f32 1.442695, %v350_v50 }
 0x311   :  { %489 = vpow2.f32 %v351_v51 }
 0x31e   :  { %v490_v52 = vpop.eup %489 }
 0x31f   :  { %353 = vadd.xlane.f32.xlu0 %v490_v52 }
 0x3a8   :  { %v354_v53 = vpop.xlane.xlu0 %353 }
 0x3a9   :  { %491 = vrcp.f32 %v354_v53 }
 0x3b6   :  { %v492_v54 = vpop.eup %491 }
 0x3b7   :  { %v356_v55 = vmul.f32 %v492_v54, %v490_v52 }
 0x3b9   :  { %358 = vst.msk [vmem:[%s697_s7] sm:$0xff] %vm357_vm2, %v356_v55 }
 0x3ba   :  { %363 = vsyncpa [#allocation3], 1 }
 0x3bb   :  { %364 = vsyncpa [#allocation5], 1 }
 0x3bc   :  { %365 = vsyncpa [#allocation8], 1 }

</bundles_post_ra>
